<compile_context>
chip_gen: v7x
topology: tpu7x:2x2x1
jax: 0.10.0
libtpu: 0.0.40
codegen_flags: <defaults>
</compile_context>

<pallas_src>
import functools

import jax
import jax.numpy as jnp
from jax.experimental import pallas as pl
from jax.experimental.pallas import tpu as pltpu


def _int_pow(x, n: int):
    """x ** n for a static non-negative integer n via square-and-multiply.

    Pure VPU multiplies -- avoids jnp.power's exp(y*log(x)) on the EUP.
    """
    if n == 0:
        return jnp.ones_like(x)
    result = None
    base = x
    while n > 0:
        if n & 1:
            result = base if result is None else result * base
        n >>= 1
        if n > 0:
            base = base * base
    return result


def _asl_tile_kernel(x_ref, t_ref, o_ref, *, n_rows, block_rows, gamma_neg,
                     gamma_pos, clip, eps, label_smooth, scale, fast):
    # Upcast in-kernel: inputs may be bf16, targets may be int8/bf16.
    x = x_ref[...].astype(jnp.float32)
    t_raw = t_ref[...].astype(jnp.float32)

    # filter_input: valid where targets >= 0 (masked instead of gathered).
    keep = t_raw >= 0.0
    if n_rows % block_rows != 0:
        # Ragged tail: rows beyond the real batch hold uninitialized VMEM.
        row0 = pl.program_id(0) * block_rows
        rows = row0 + jax.lax.broadcasted_iota(jnp.int32, x.shape, 0)
        keep = jnp.logical_and(keep, rows < n_rows)

    # label_smoothing(targets, label_smooth)
    if label_smooth > 0.0:
        t_s = t_raw * (1.0 - label_smooth)
        t_s = jnp.where(t_s == 0.0, jnp.float32(label_smooth), t_s)
    else:
        t_s = t_raw
    # Sanitize invalid / out-of-range targets so downstream math stays in range.
    targets = jnp.where(keep, t_s, 0.0)

    # sigmoid(scale * inputs) on the EUP.
    xs_pos = jax.nn.sigmoid(jnp.float32(scale) * x)
    xs_neg = 1.0 - xs_pos
    if clip is not None and clip > 0.0:
        xs_neg = jnp.minimum(xs_neg + jnp.float32(clip), 1.0)

    eps_f = jnp.float32(eps)
    if fast:
        # Binarized targets {0,1}: exactly one of the two log terms is nonzero,
        # so fuse them into a single log (one fewer EUP transcendental/elem).
        t_bin = targets >= 0.5
        loss = jnp.log(jnp.where(t_bin, jnp.maximum(xs_pos, eps_f),
                                 jnp.maximum(xs_neg, eps_f)))
        if gamma_neg > 0 or gamma_pos > 0:
            base_pos = 1.0 - xs_pos          # target == 1 branch
            base_neg = 1.0 - xs_neg          # target == 0 branch (clipped xs_neg)

            def _pow(b, g):
                if float(g).is_integer() and g >= 0:
                    return _int_pow(b, int(g))     # VPU square-and-multiply
                return jnp.power(b, jnp.float32(g))  # EUP fallback

            if gamma_pos == gamma_neg:
                asymmetric_w = _pow(jnp.where(t_bin, base_pos, base_neg),
                                    gamma_neg)
            elif gamma_pos == 0:
                # Default config: avoid materializing a ones broadcast.
                asymmetric_w = jnp.where(t_bin, jnp.float32(1.0),
                                         _pow(base_neg, gamma_neg))
            elif gamma_neg == 0:
                asymmetric_w = jnp.where(t_bin, _pow(base_pos, gamma_pos),
                                         jnp.float32(1.0))
            else:
                asymmetric_w = jnp.where(t_bin, _pow(base_pos, gamma_pos),
                                         _pow(base_neg, gamma_neg))
            loss = loss * asymmetric_w
    else:
        # General path: bit-parity with the torch formula (label smoothing /
        # soft targets / fractional gammas).
        anti_targets = 1.0 - targets
        loss = targets * jnp.log(jnp.maximum(xs_pos, eps_f))
        loss = loss + anti_targets * jnp.log(jnp.maximum(xs_neg, eps_f))
        if gamma_neg > 0 or gamma_pos > 0:
            base = 1.0 - xs_pos * targets - xs_neg * anti_targets
            exponent = (jnp.float32(gamma_pos) * targets
                        + jnp.float32(gamma_neg) * anti_targets)
            loss = loss * jnp.power(base, exponent)

    # Drop invalid (targets < 0) and out-of-range elements via a SELECT (never
    # a multiply), so NaN/Inf from garbage tail rows is contained.
    loss = jnp.where(keep, loss, 0.0)

    # Lane-vector partial per block: sublane-direction adds only; the final
    # cross-lane reduce + negate happens once in the wrapper.
    o_ref[0] = jnp.sum(loss, axis=0, keepdims=True)


def _vmem_capacity_bytes():
    """Physical VMEM of the attached chip; conservative v7x default on failure."""
    try:
        info = pltpu.get_tpu_info()
        cap = getattr(info, "vmem_capacity_bytes", None)
        if cap:
            return int(cap)
    except Exception:
        pass
    return 64 * 1024 * 1024


def _choose_block_rows(n, c, x_itemsize, t_itemsize, budget_bytes):
    """Row-block size: multiple of 8, 2-operand x 2-buffer set <= budget_bytes."""
    per_row_bytes = 2 * c * (x_itemsize + t_itemsize)
    br = budget_bytes // max(per_row_bytes, 1)
    br = max(8, (br // 8) * 8)
    # v7x has 2 TensorCores: keep >= 2 blocks on the "parallel" axis whenever
    # there are enough rows so both cores get work.
    if n >= 16:
        half = (((n + 1) // 2) + 7) // 8 * 8
        br = min(br, half)
    # Never larger than the (8-rounded) problem itself.
    br = min(br, ((n + 7) // 8) * 8)
    return int(max(br, 8))


def asymmetric_loss(inputs, targets, *, gamma_neg=4, gamma_pos=0,
                    probability_margin=0.05, eps=1e-8, label_smooth=0.0,
                    scale=1.0, binarized_targets=True, block_rows=None):
    """Pallas TPU implementation of AsymmetricLoss.forward. Returns scalar f32.

    `binarized_targets=True` asserts the module's contract (targets are a
    multi-label binarized vector, elements < 0 ignored) and enables the fused
    log / selected integer-power fast path; set False for soft targets.
    """
    assert inputs.shape == targets.shape and inputs.ndim == 2
    n, c = inputs.shape

    vmem_cap = _vmem_capacity_bytes()
    if block_rows is None:
        block_rows = _choose_block_rows(
            n, c, jnp.dtype(inputs.dtype).itemsize,
            jnp.dtype(targets.dtype).itemsize, budget_bytes=vmem_cap // 4)
    assert block_rows % 8 == 0 and block_rows > 0
    num_blocks = (n + block_rows - 1) // block_rows   # ragged tail masked in-kernel

    fast = bool(binarized_targets) and label_smooth == 0.0

    kernel = functools.partial(
        _asl_tile_kernel,
        n_rows=n, block_rows=block_rows, gamma_neg=gamma_neg,
        gamma_pos=gamma_pos, clip=probability_margin, eps=eps,
        label_smooth=label_smooth, scale=scale, fast=fast)

    partials = pl.pallas_call(
        kernel,
        out_shape=jax.ShapeDtypeStruct((num_blocks, 1, c), jnp.float32),
        grid=(num_blocks,),
        in_specs=[
            pl.BlockSpec((block_rows, c), lambda i: (i, 0)),
            pl.BlockSpec((block_rows, c), lambda i: (i, 0)),
        ],
        out_specs=pl.BlockSpec((1, 1, c), lambda i: (i, 0, 0)),
        compiler_params=pltpu.CompilerParams(
            dimension_semantics=("parallel",),
            vmem_limit_bytes=int(vmem_cap // 2)),
    )(inputs, targets)

    # Final reduce + negate (matches `-self.loss.sum()`); all-invalid input
    # yields -0.0, numerically equal to PyTorch's early-return 0.0.
    return -jnp.sum(partials)


def _asl_reference(inputs, targets, *, gamma_neg=4, gamma_pos=0,
                   probability_margin=0.05, eps=1e-8, label_smooth=0.0,
                   scale=1.0):
    """Pure-JAX reference mirroring the PyTorch forward (masked form)."""
    inputs = inputs.astype(jnp.float32)
    targets = targets.astype(jnp.float32)
    valid = targets >= 0
    t = targets
    if label_smooth > 0.0:
        t = t * (1.0 - label_smooth)
        t = jnp.where(t == 0.0, label_smooth, t)
    t = jnp.where(valid, t, 0.0)
    anti = 1.0 - t
    xs_pos = jax.nn.sigmoid(scale * inputs)
    xs_neg = 1.0 - xs_pos
    if probability_margin is not None and probability_margin > 0:
        xs_neg = jnp.minimum(xs_neg + probability_margin, 1.0)
    loss = t * jnp.log(jnp.maximum(xs_pos, eps))
    loss = loss + anti * jnp.log(jnp.maximum(xs_neg, eps))
    if gamma_neg > 0 or gamma_pos > 0:
        w = jnp.power(1.0 - xs_pos * t - xs_neg * anti,
                      gamma_pos * t + gamma_neg * anti)
        loss = loss * w
    loss = jnp.where(valid, loss, 0.0)
    return -jnp.sum(loss)


if __name__ == "__main__":
    key = jax.random.PRNGKey(0)
    k1, k2, k3 = jax.random.split(key, 3)

    N, C = 20, 96  # small multi-label problem; N not a multiple of 8 -> ragged tail
    inputs = jax.random.normal(k1, (N, C), dtype=jnp.float32) * 2.0

    # Multi-label binarized targets in {0, 1}; some entries -1 (ignored).
    targets = (jax.random.uniform(k2, (N, C)) < 0.3).astype(jnp.float32)
    ignore = jax.random.uniform(k3, (N, C)) < 0.1
    targets = jnp.where(ignore, -1.0, targets)

    ref1 = _asl_reference(inputs, targets)

    # 1) Defaults, forced multi-block grid (ragged tail mask + per-block partials).
    out1 = jax.block_until_ready(asymmetric_loss(inputs, targets, block_rows=8))
    assert jnp.allclose(out1, ref1, rtol=2e-4, atol=1e-3), (out1, ref1)

    # 2) Defaults, auto block size (>= 2 parallel blocks, ragged tail in block 1).
    out2 = jax.block_until_ready(asymmetric_loss(inputs, targets))
    assert jnp.allclose(out2, ref1, rtol=2e-4, atol=1e-3), (out2, ref1)

    # 3) Label smoothing + non-default gamma/scale -> general jnp.power path.
    out3 = jax.block_until_ready(
        asymmetric_loss(inputs, targets, gamma_pos=1, label_smooth=0.1,
                        scale=2.0, block_rows=8))
    ref3 = _asl_reference(inputs, targets, gamma_pos=1, label_smooth=0.1, scale=2.0)
    assert jnp.allclose(out3, ref3, rtol=2e-4, atol=1e-3), (out3, ref3)

    # 4) Narrow dtypes from the caller (bf16 logits, int8 targets): fewer HBM
    #    bytes on v5e/v6e; kernel upcasts so the math is still f32.
    x_bf16 = inputs.astype(jnp.bfloat16)
    t_i8 = targets.astype(jnp.int8)
    out4 = jax.block_until_ready(asymmetric_loss(x_bf16, t_i8))
    ref4 = _asl_reference(x_bf16.astype(jnp.float32), t_i8.astype(jnp.float32))
    assert jnp.allclose(out4, ref4, rtol=2e-4, atol=1e-3), (out4, ref4)

    print("KERNEL_OK")
</pallas_src>

<mosaic_0001>
module attributes {stable_mosaic.version = 11 : i64} {
  func.func @_asl_tile_kernel(%arg0: i32, %arg1: memref<8x96xf32, #tpu.memory_space<vmem>>, %arg2: memref<8x96xf32, #tpu.memory_space<vmem>>, %arg3: memref<1x1x96xf32, #tpu.memory_space<vmem>>) attributes {dimension_semantics = [#tpu.dimension_semantics<parallel>], iteration_bounds = array<i64: 3>, scalar_prefetch = 0 : i64, scratch_operands = 0 : i64, tpu.core_type = #tpu.core_type<tc>, window_params = [{transform_indices = @transform_0, window_bounds = array<i64: 8, 96>}, {transform_indices = @transform_1, window_bounds = array<i64: 8, 96>}, {transform_indices = @transform_2, window_bounds = array<i64: 1, 1, 96>}]} {
    %c0 = arith.constant 0 : index
    %c0_0 = arith.constant 0 : index
    %0 = vector.load %arg1[%c0, %c0_0] : memref<8x96xf32, #tpu.memory_space<vmem>>, vector<8x96xf32>
    %c0_1 = arith.constant 0 : index
    %c0_2 = arith.constant 0 : index
    %1 = vector.load %arg2[%c0_1, %c0_2] : memref<8x96xf32, #tpu.memory_space<vmem>>, vector<8x96xf32>
    %cst = arith.constant 0.000000e+00 : f32
    %2 = vector.broadcast %cst : f32 to vector<8x96xf32>
    %3 = arith.cmpf oge, %1, %2 : vector<8x96xf32>
    %c8_i32 = arith.constant 8 : i32
    %4 = arith.muli %arg0, %c8_i32 : i32
    %5 = tpu.iota {dimensions = array<i32: 0>} : vector<8x96xi32>
    %6 = vector.broadcast %4 : i32 to vector<8x96xi32>
    %7 = arith.addi %6, %5 : vector<8x96xi32>
    %c20_i32 = arith.constant 20 : i32
    %8 = vector.broadcast %c20_i32 : i32 to vector<8x96xi32>
    %9 = arith.cmpi slt, %7, %8 : vector<8x96xi32>
    %10 = arith.andi %3, %9 : vector<8x96xi1>
    %cst_3 = arith.constant 0.000000e+00 : f32
    %11 = vector.broadcast %cst_3 : f32 to vector<8x96xf32>
    %12 = arith.select %10, %1, %11 : vector<8x96xi1>, vector<8x96xf32>
    %cst_4 = arith.constant 1.000000e+00 : f32
    %13 = vector.broadcast %cst_4 : f32 to vector<8x96xf32>
    %14 = arith.mulf %13, %0 : vector<8x96xf32>
    %15 = arith.negf %14 : vector<8x96xf32>
    %16 = math.exp %15 : vector<8x96xf32>
    %cst_5 = arith.constant 1.000000e+00 : f32
    %17 = vector.broadcast %cst_5 : f32 to vector<8x96xf32>
    %18 = arith.addf %17, %16 : vector<8x96xf32>
    %19 = arith.divf %17, %18 : vector<8x96xf32>
    %cst_6 = arith.constant 1.000000e+00 : f32
    %20 = vector.broadcast %cst_6 : f32 to vector<8x96xf32>
    %21 = arith.subf %20, %19 : vector<8x96xf32>
    %cst_7 = arith.constant 5.000000e-02 : f32
    %22 = vector.broadcast %cst_7 : f32 to vector<8x96xf32>
    %23 = arith.addf %21, %22 : vector<8x96xf32>
    %cst_8 = arith.constant 1.000000e+00 : f32
    %24 = vector.broadcast %cst_8 : f32 to vector<8x96xf32>
    %25 = arith.minimumf %23, %24 : vector<8x96xf32>
    %cst_9 = arith.constant 5.000000e-01 : f32
    %26 = vector.broadcast %cst_9 : f32 to vector<8x96xf32>
    %27 = arith.cmpf oge, %12, %26 : vector<8x96xf32>
    %cst_10 = arith.constant 9.99999993E-9 : f32
    %28 = vector.broadcast %cst_10 : f32 to vector<8x96xf32>
    %29 = arith.maximumf %19, %28 : vector<8x96xf32>
    %cst_11 = arith.constant 9.99999993E-9 : f32
    %30 = vector.broadcast %cst_11 : f32 to vector<8x96xf32>
    %31 = arith.maximumf %25, %30 : vector<8x96xf32>
    %32 = arith.select %27, %29, %31 : vector<8x96xi1>, vector<8x96xf32>
    %33 = math.log %32 : vector<8x96xf32>
    %cst_12 = arith.constant 1.000000e+00 : f32
    %34 = vector.broadcast %cst_12 : f32 to vector<8x96xf32>
    %35 = arith.subf %34, %25 : vector<8x96xf32>
    %36 = arith.mulf %35, %35 : vector<8x96xf32>
    %37 = arith.mulf %36, %36 : vector<8x96xf32>
    %cst_13 = arith.constant 1.000000e+00 : f32
    %38 = vector.broadcast %cst_13 : f32 to vector<8x96xf32>
    %39 = arith.select %27, %38, %37 : vector<8x96xi1>, vector<8x96xf32>
    %40 = arith.mulf %33, %39 : vector<8x96xf32>
    %cst_14 = arith.constant 0.000000e+00 : f32
    %41 = vector.broadcast %cst_14 : f32 to vector<8x96xf32>
    %42 = arith.select %10, %40, %41 : vector<8x96xi1>, vector<8x96xf32>
    %cst_15 = arith.constant dense<0.000000e+00> : vector<96xf32>
    %43 = vector.multi_reduction <add>, %42, %cst_15 [0] : vector<8x96xf32> to vector<96xf32>
    %44 = vector.shape_cast %43 : vector<96xf32> to vector<1x96xf32>
    %c0_16 = arith.constant 0 : index
    %c0_17 = arith.constant 0 : index
    %c0_18 = arith.constant 0 : index
    %45 = vector.load %arg3[%c0_16, %c0_17, %c0_18] : memref<1x1x96xf32, #tpu.memory_space<vmem>>, vector<1x1x96xf32>
    %46 = vector.shape_cast %45 : vector<1x1x96xf32> to vector<1x96xf32>
    %47 = vector.shape_cast %44 : vector<1x96xf32> to vector<1x1x96xf32>
    tpu.vector_store %arg3[%c0_16, %c0_17, %c0_18], %47 {strides = array<i32>} : memref<1x1x96xf32, #tpu.memory_space<vmem>>, vector<1x1x96xf32>,
    return
  }
  func.func @transform_0(%arg0: i32) -> (i32, i32) {
    %c0_i32 = arith.constant 0 : i32
    %c0_i32_0 = arith.constant 0 : i32
    return %arg0, %c0_i32 : i32, i32
  }
  func.func @transform_1(%arg0: i32) -> (i32, i32) {
    %c0_i32 = arith.constant 0 : i32
    %c0_i32_0 = arith.constant 0 : i32
    return %arg0, %c0_i32 : i32, i32
  }
  func.func @transform_2(%arg0: i32) -> (i32, i32, i32) {
    %c0_i32 = arith.constant 0 : i32
    %c0_i32_0 = arith.constant 0 : i32
    %c0_i32_1 = arith.constant 0 : i32
    return %arg0, %c0_i32, %c0_i32_0 : i32, i32, i32
  }
}

</mosaic_0001>

<bundles_post_ra>
// kernel: tpu_custom_call.1
= control target key start
LH: loop header
LB: loop body
LE: loop exit
PB: predicated region body
PF: predicated region fallthrough
CT: control target
= control target key end

     0   :  { %7 = vsyncpa [#allocation3], 0  ;;  %s778_s0 = inlined_call_operand.hbm [shape: f32[20,96], index: 0, kind: input, shape index: {}]   ;;  %s779_s1 = inlined_call_operand.hbm [shape: f32[20,96], index: 1, kind: input, shape index: {}]   ;;  %s780_s2 = inlined_call_operand.hbm [shape: f32[3,1,96], index: 2, kind: output, shape index: {}]  }
   0x1   :  { %9 = vsyncpa [#allocation3 + $0x1], 0 }
   0x2   :  { %10 = vsyncpa [#allocation6], 0 }
   0x3   :  { %12 = vsyncpa [#allocation6 + $0x1], 0 }
   0x4   :  { %13 = vsyncpa [#allocation4], 0 }
   0x5   :  { %15 = vsyncpa [#allocation4 + $0x1], 0  ;;  %s561_s9 = smov 0   ;;  %s563_s10 = smov 0  }
   0x6   :  { %s565_s11 = smov 0   ;;  %s567_s12 = smov 0  }
   0x7 LB: > { %s582_s13 = sadd.s32 4294967295, %s541_s12   ;;  %s339_s14 = sadd.s32 4294967294, %s541_s12   ;;  %s541_s12 = sphi %s567_s12, %s800_s12   ;;  %s537_s11 = sphi %s565_s11, %s799_s11   ;;  %s533_s10 = sphi %s563_s10, %s798_s10   ;;  %s529_s9 = sphi %s561_s9, %s797_s9  }
   0x8   : > { %s586_s15 = sadd.s32 1, %s541_s12   ;;  %s28_s16 = sadd.s32 1, %s537_s11 }
   0x9   : > { %s25_s17 = ssub.s32 %s541_s12, %s586_s15  ;;  %p35_p0 = scmp.ne.s32.totalorder %s537_s11, %s533_s10 }
   0xa   : > { %p26_p1 = scmp.eq.s32.totalorder %s25_s17, 0  ;;  %p36_p2 = scmp.eq.s32.totalorder %s541_s12, 0 }
   0xb   : > { %p41_p3 = scmp.ne.s32.totalorder %s533_s10, %s529_s9  ;;  %p42_p4 = scmp.eq.s32.totalorder %s582_s13, 0 }
   0xc   : > { %s598_s18 = scalar_select %p26_p1, %s537_s11, %s28_s16  }
   0xd   : > { %p600_p5 = por %p36_p2, %p35_p0  ;;  %p604_p6 = por %p42_p4, %p41_p3 }
   0xe   : > { %p91_p7 = scmp.eq.s32.totalorder %s582_s13, 2  ;;  %p97_p8 = scmp.eq.s32.totalorder %s339_s14, 2 }
   0xf   : > { %s784_s20 = scalar_select %p604_p6, 1, 0 }
  0x10   : > { %p371_p9 = scmp.lt.s32.totalorder %s541_s12, 3  ;;  %p610_p10 = por %p91_p7, %p35_p0 }
  0x11   : > { %p614_p11 = por %p97_p8, %p41_p3  ;;  %s619_s23 = sand.u32 1, %s537_s11  }
  0x12   : > { %s785_s21 = scalar_select %p610_p10, 1, 0 }
  0x13   : > { %s786_s22 = scalar_select %p614_p11, 1, 0 }
  0x14   : > { %s343_s24 = sshll.u32 %s541_s12, 7  ;;  %s342_s25 = sshll.u32 %s619_s23, 3 }
  0x15   : > { %s628_s28 = scalar_lea.hbm %s778_s0, %s343_s24  ;;  %s121_s29 = scalar_lea.vmem [#allocation2], %s342_s25 }
  0x16   : > { %s128_s30 = sshll.u32 %s121_s29, 4  ;;  %p634_p12 = pnand %p371_p9, %p600_p5  ;;  %s638_s30 = int_to_ptr.vmem [resolvable:$true] %s128_s30 }
  0x17   : > { %s118_s4 = scalar_lea.sflag [#allocation3], %s619_s23  ;;  %s411_s5 = scalar_lea.hbm %s628_s28, 128 }
  0x18   : > { %p412_p1 = scmp.ne.s32.totalorder %s628_s28, %s411_s5  ;;  %p413_p2 = pneg %p634_p12 }
  0x19   : > { %s416_s8 = scalar_lea.hbm %s778_s0, 384  ;;  %p417_p5 = scmp.lt.u32.totalorder %s628_s28, %s778_s0 }
  0x1a   : > { %p414_p3 = pnand %p413_p2, %p412_p1  ;;  %p418_p7 = scmp.lt.u32.totalorder %s416_s8, %s411_s5 }
  0x1b   : > { %p420_p9 = scmp.lt.u32.totalorder %s411_s5, %s628_s28 }
  0x1c   : > { %p415_p4 = pneg %p414_p3  ;;  %p419_p8 = por %p418_p7, %p417_p5 }
  0x1e   : > { %p421_p13 = por %p420_p9, %p419_p8 }
  0x20   : > { %p422_p0 = pnand %p421_p13, %p415_p4 }
  0x22   : > { %425 = shalt.err (!%p422_p0)
}
  0x23   : > { %s426_s17 = scalar_lea.vmem %s638_s30, 128  ;;  %s543_s19 = smov [#allocation2]  }
  0x24   : > { %p427_p1 = scmp.ne.s32.totalorder %s638_s30, %s426_s17  ;;  %s431_s26 = sshll.u32 %s543_s19, 4  ;;  %s432_s26 = int_to_ptr.vmem [resolvable:$false] %s431_s26 }
  0x25   : > { %s433_s27 = scalar_lea.vmem %s432_s26, 256  ;;  %p434_p10 = scmp.lt.s32.totalorder %s638_s30, %s432_s26 }
  0x26   : > { %p429_p3 = pnand %p427_p1, %p413_p2  ;;  %p435_p5 = scmp.lt.s32.totalorder %s433_s27, %s426_s17 }
  0x28   : > { %p430_p11 = pneg %p429_p3  ;;  %p436_p7 = por %p435_p5, %p434_p10 }
  0x2a   : > { %p437_p8 = pnand %p436_p7, %p430_p11 }
  0x2c   : > { %440 = shalt.err (!%p437_p8)
}
  0x2d   : > { %363 = dma.hbm_to_vmem [thread:$0]  (!%p634_p12), %s628_s28, 128, %s638_s30, %s118_s4  }
  0x2e   : > { %p788_p13 = scmp.lt.s32.totalorder %s541_s12, 4  ;;  %p789_p0 = scmp.ge.s32.totalorder %s541_s12, 1 }
  0x2f   : > { %s681_s7 = scalar_lea.hbm %s779_s1, %s343_s24  ;;  %s139_s8 = scalar_lea.vmem [#allocation5], %s342_s25 }
  0x30   : > { %p672_p4 = pnand %p789_p0, %p788_p13  ;;  %s146_s14 = sshll.u32 %s139_s8, 4  ;;  %s147_s14 = int_to_ptr.vmem [resolvable:$true] %s146_s14 }
  0x31   : > { %s136_s28 = scalar_lea.sflag [#allocation6], %s619_s23  ;;  %s441_s30 = scalar_lea.hbm %s681_s7, 128 }
  0x32   : > { %s790_s29 = scalar_select %p672_p4, 1, 0 }
  0x33   : > { %p442_p10 = scmp.ne.s32.totalorder %s681_s7, %s441_s30  ;;  %s446_s24 = scalar_lea.hbm %s779_s1, 384 }
  0x34   : > { %p447_p1 = scmp.lt.u32.totalorder %s681_s7, %s779_s1  ;;  %p448_p3 = scmp.lt.u32.totalorder %s446_s24, %s441_s30 }
  0x35   : > { %p444_p11 = pnand %p442_p10, %p413_p2  ;;  %p450_p7 = scmp.lt.u32.totalorder %s441_s30, %s681_s7 }
  0x36   : > { %p449_p5 = por %p448_p3, %p447_p1 }
  0x37   : > { %p445_p9 = pneg %p444_p11 }
  0x38   : > { %p451_p8 = por %p450_p7, %p449_p5 }
  0x3a   : > { %p452_p13 = pnand %p451_p8, %p445_p9 }
  0x3c   : > { %455 = shalt.err (!%p452_p13)
}
  0x3d   : > { %s456_s23 = scalar_lea.vmem %s147_s14, 128  ;;  %s544_s25 = smov [#allocation5]  }
  0x3e   : > { %p457_p0 = scmp.ne.s32.totalorder %s147_s14, %s456_s23  ;;  %s461_s26 = sshll.u32 %s544_s25, 4  ;;  %s462_s26 = int_to_ptr.vmem [resolvable:$false] %s461_s26 }
  0x3f   : > { %s463_s27 = scalar_lea.vmem %s462_s26, 256  ;;  %p464_p6 = scmp.lt.s32.totalorder %s147_s14, %s462_s26 }
  0x40   : > { %p459_p10 = pnand %p457_p0, %p413_p2  ;;  %p465_p4 = scmp.lt.s32.totalorder %s463_s27, %s456_s23 }
  0x42   : > { %p460_p11 = pneg %p459_p10  ;;  %p466_p1 = por %p465_p4, %p464_p6 }
  0x44   : > { %p467_p3 = pnand %p466_p1, %p460_p11 }
  0x46   : > { %470 = shalt.err (!%p467_p3)
}
  0x47   : > { %366 = dma.hbm_to_vmem [thread:$0]  (!%p634_p12), %s681_s7, 128, %s147_s14, %s136_s28  }
  0x48   : > { %p791_p9 = scmp.ne.s32.totalorder %s790_s29, 0 }
  0x49   : > { %s708_s5 = sand.u32 (!%p791_p9), 1, %s533_s10   ;;  %p792_p2 = scmp.ne.s32.totalorder (!%p791_p9), %s784_s20, 0 }
  0x4a   : > { %155 = sbr.rel (%p791_p9) target bundleno = 163 (0xa3), region = 28  ;;  %s347_s6 = sshll.u32 (!%p791_p9), %s708_s5, 3 }
  0x4b   : > { %s158_s8 = scalar_lea.sflag (!%p791_p9), [#allocation3], %s708_s5  ;;  %s161_s30 = scalar_lea.vmem (!%p791_p9), [#allocation2], %s347_s6 }
  0x51   : > { %516 = dma.done.wait (%p792_p2), %s158_s8, 128  }
  0x52   : > { %518 = vsyncadd (%p792_p2), %s158_s8, 4294967168  ;;  %s167_s3 = scalar_lea.sflag [#allocation6], %s708_s5  ;;  %s170_s7 = scalar_lea.vmem [#allocation5], %s347_s6 }
  0x53   : > { %520 = dma.done.wait (%p792_p2), %s167_s3, 128  }
  0x54   : > { %522 = vsyncadd (%p792_p2), %s167_s3, 4294967168  ;;  %v195_v0 = vld [vmem:[%s161_s30] sm:$0xff]  ;;  %v199_v2 = vlaneseq  ;;  %s349_s29 = sshll.u32 %s582_s13, 3  ;;  %v196_v8 = vld [vmem:[%s170_s7] sm:$0xff]  ;;  %vm227_vm4 = vcmask 785408   ;;  %s194_s20 = scalar_lea.vmem [#allocation7], %s708_s5 }
  0x55   : > { %v350_v1 = vmul.f32 -1.442695, %v195_v0  ;;  %v201_v6 = vstv %s349_s29  ;;  %vm197_vm0 = vcmp.ge.f32.partialorder %v196_v8, 0.0  ;;  %s250_s14 = sshll.u32 %s194_s20, 4  ;;  %s351_s28 = sshll.u32 %s582_s13, 4  ;;  %vm235_vm5 = vcmask 778240   ;;  %s732_s14 = int_to_ptr.vmem [resolvable:$true] %s250_s14 }
  0x56   : > { %v200_v5 = vshrl.u32 %v199_v2, 7  ;;  %s737_s24 = scalar_lea.hbm %s780_s2, %s351_s28  ;;  %s238_s17 = scalar_lea.sflag [#allocation4], %s708_s5 }
  0x57   : > { %405 = vpow2.f32 %v350_v1  ;;  %s471_s19 = scalar_lea.vmem %s732_s14, 16  ;;  %p795_p12 = scmp.ne.s32.totalorder %s785_s21, 0 }
  0x58   : > { %v202_v7 = vadd.s32 %v201_v6, %v200_v5  ;;  %p472_p6 = scmp.ne.s32.totalorder %s732_s14, %s471_s19  ;;  %s545_s13 = smov [#allocation7]  }
  0x59   : > { %s475_s23 = sshll.u32 %s545_s13, 4  ;;  %s476_s23 = int_to_ptr.vmem [resolvable:$false] %s475_s23 }
  0x5a   : > { %vm203_vm1 = vcmp.lt.s32.totalorder %v202_v7, 20  ;;  %p473_p4 = pnand %p472_p6, %p795_p12  ;;  %s477_s25 = scalar_lea.vmem %s476_s23, 32 }
  0x5b   : > { %vm722_vm2 = vmand %vm197_vm0, %vm203_vm1  ;;  %p478_p7 = scmp.lt.s32.totalorder %s732_s14, %s476_s23  ;;  %p479_p8 = scmp.lt.s32.totalorder %s477_s25, %s471_s19 }
  0x5c   : > { %v205_v12 = vsel %vm722_vm2, %v196_v8, 0.0  ;;  %p474_p5 = pneg %p473_p4 }
  0x5d   : > { %vm215_vm3 = vcmp.ge.f32.partialorder %v205_v12, 0.5  ;;  %p480_p13 = por %p479_p8, %p478_p7 }
  0x5f   : > { %p481_p0 = pnand %p480_p13, %p474_p5 }
  0x61   : > { %v406_v3 = vpop.eup %405 }
  0x62   : > { %v209_v4 = vadd.f32 1.0, %v406_v3 }
  0x64   : > { %407 = vrcp.f32 %v209_v4 }
  0x6e   : > { %v408_v9 = vpop.eup %407 }
  0x6f   : > { %v212_v11 = vsub.f32 1.0, %v408_v9  ;;  %v216_v15 = vmax.f32 %v408_v9, 1e-08 }
  0x71   : > { %v213_v13 = vadd.f32 0.05, %v212_v11 }
  0x73   : > { %v214_v14 = vmin.f32 %v213_v13, 1.0 }
  0x75   : > { %v217_v16 = vmax.f32 %v214_v14, 1e-08  ;;  %v221_v17 = vsub.f32 1.0, %v214_v14 }
  0x77   : > { %v218_v18 = vsel %vm215_vm3, %v216_v15, %v217_v16  ;;  %v222_v19 = vmul.f32 %v221_v17, %v221_v17 }
  0x78   : > { %409 = vlog2.f32 %v218_v18 }
  0x79   : > { %v223_v20 = vmul.f32 %v222_v19, %v222_v19 }
  0x7b   : > { %v224_v22 = vsel %vm215_vm3, 1.0, %v223_v20 }
  0x82   : > { %v410_v21 = vpop.eup %409 }
  0x83   : > { %v220_v23 = vmul.f32 0.6931472, %v410_v21 }
  0x85   : > { %v225_v24 = vmul.f32 %v224_v22, %v220_v23 }
  0x87   : > { %v226_v25 = vsel %vm722_vm2, %v225_v24, 0.0 }
  0x88   : > { %v228_v26 = vsel %vm227_vm4, %v226_v25, 0.0 }
  0x89   : > { %v229_v27 = vrot.slane %v228_v26, 4 }
  0x8b   : > { %v230_v28 = vadd.f32 %v229_v27, %v228_v26 }
  0x8d   : > { %v231_v29 = vrot.slane %v230_v28, 2 }
  0x8f   : > { %v232_v30 = vadd.f32 %v231_v29, %v230_v28 }
  0x91   : > { %v233_v31 = vrot.slane %v232_v30, 1 }
  0x93   : > { %v234_v32 = vadd.f32 %v233_v31, %v232_v30 }
  0x95   : > { %236 = vst.msk [vmem:[%s194_s20] sm:$0x1] %vm235_vm5, %v234_v32 }
  0x96   : > { %484 = shalt.err (!%p481_p0)
}
  0x97   : > { %s485_s26 = scalar_lea.hbm %s737_s24, 16  ;;  %s489_s6 = scalar_lea.hbm %s780_s2, 48 }
  0x98   : > { %p486_p10 = scmp.ne.s32.totalorder %s737_s24, %s485_s26  ;;  %p490_p3 = scmp.lt.u32.totalorder %s737_s24, %s780_s2 }
  0x99   : > { %p491_p9 = scmp.lt.u32.totalorder %s489_s6, %s485_s26  ;;  %p493_p6 = scmp.lt.u32.totalorder %s485_s26, %s737_s24 }
  0x9a   : > { %p487_p11 = pnand %p486_p10, %p795_p12 }
  0x9b   : > { %p492_p2 = por %p491_p9, %p490_p3 }
  0x9c   : > { %p488_p1 = pneg %p487_p11 }
  0x9d   : > { %p494_p4 = por %p493_p6, %p492_p2 }
  0x9f   : > { %p495_p5 = pnand %p494_p4, %p488_p1 }
  0xa1   : > { %498 = shalt.err (!%p495_p5)
}
  0xa2   : > { %358 = dma.vmem_to_hbm [thread:$0]  (%p795_p12), %s732_s14, 16, %s737_s24, %s238_s17  }
  0xa3 PF: > { %p372_p7 = scmp.ge.s32.totalorder %s541_s12, 2  ;;  %s262_s3 = sand.u32 1, %s529_s9  }
  0xa4   : > { %p796_p8 = scmp.ne.s32.totalorder %s786_s22, 0  ;;  %s263_s7 = scalar_lea.sflag [#allocation4], %s262_s3 }
  0xa6   : > { %p368_p13 = pnand %p372_p7, %p796_p8 }
  0xa8   : > { %524 = dma.done.wait (!%p368_p13), %s263_s7, 16  }
  0xa9   : > { %526 = vsyncadd (!%p368_p13), %s263_s7, 4294967280  ;;  %p18_p0 = scmp.ge.s32.totalorder %s586_s15, 5   ;;  %s797_s9 = smov %s533_s10 }
  0xaa   : > { %s798_s10 = smov %s537_s11  ;;  %s799_s11 = smov %s598_s18 }
  0xab   : > { %s800_s12 = smov %s586_s15  ;;  %20 = sbr.rel (!%p18_p0) target bundleno = 7 (0x7), region = 86 }
  0xb2   :  { %267 = vsyncpa [#allocation3], 1 }
  0xb3   :  { %269 = vsyncpa [#allocation3 + $0x1], 1 }
  0xb4   :  { %270 = vsyncpa [#allocation6], 1 }
  0xb5   :  { %272 = vsyncpa [#allocation6 + $0x1], 1 }
  0xb6   :  { %273 = vsyncpa [#allocation4], 1 }
  0xb7   :  { %275 = vsyncpa [#allocation4 + $0x1], 1 }

</bundles_post_ra>
